<compile_context>
chip_gen: v6e
topology: v6e:2x2x1
jax: 0.10.0
libtpu: 0.0.40
codegen_flags: <defaults>
</compile_context>

<pallas_src>
import functools
import math

import jax
import jax.numpy as jnp
from jax.experimental import pallas as pl
from jax.experimental.pallas import tpu as pltpu


def _round_up(v, m):
    return ((v + m - 1) // m) * m


def _largest_tile(dim_padded, target, unit):
    """Largest multiple of `unit` <= target that exactly divides dim_padded."""
    cap = min(target, dim_padded)
    cap = (cap // unit) * unit
    for t in range(cap, unit - 1, -unit):
        if dim_padded % t == 0:
            return t
    return unit


# ----------------------------------------------------------------------------
# Kernels
# ----------------------------------------------------------------------------
def _fc_kernel_f32out(x_ref, w_ref, b_ref, o_ref, *, weight_gain, k_axis):
    # o_ref is f32 and its block index is constant along the K grid axis, so the
    # block stays resident in VMEM: accumulate into it directly (no scratch).
    k = pl.program_id(k_axis)

    @pl.when(k == 0)
    def _():
        o_ref[...] = jnp.zeros_like(o_ref)

    o_ref[...] += jnp.dot(x_ref[...], w_ref[...],
                          preferred_element_type=jnp.float32)

    @pl.when(k == pl.num_programs(k_axis) - 1)
    def _():
        o_ref[...] = o_ref[...] * jnp.float32(weight_gain) + b_ref[...]


def _fc_kernel_acc(x_ref, w_ref, b_ref, o_ref, acc_ref, *, weight_gain, k_axis):
    # Low-precision output: keep an f32 VMEM accumulator, cast once at the end.
    k = pl.program_id(k_axis)

    @pl.when(k == 0)
    def _():
        acc_ref[...] = jnp.zeros_like(acc_ref)

    acc_ref[...] += jnp.dot(x_ref[...], w_ref[...],
                            preferred_element_type=jnp.float32)

    @pl.when(k == pl.num_programs(k_axis) - 1)
    def _():
        o_ref[...] = (acc_ref[...] * jnp.float32(weight_gain)
                      + b_ref[...]).astype(o_ref.dtype)


# ----------------------------------------------------------------------------
# One-time parameter preparation (hoist out of the forward hot path)
# ----------------------------------------------------------------------------
def prepare_fc_params(weight, bias=None, *, lr_multiplier=1.0,
                      compute_dtype=jnp.bfloat16):
    """Transpose weight to K-major, cast to the MXU compute dtype, pad to 128
    alignment, and fold bias_gain into an f32 bias row. Call once per layer."""
    N, K = weight.shape
    K_pad = _round_up(K, 128)
    N_pad = _round_up(N, 128)

    w_t = weight.T.astype(compute_dtype)                  # (K, N) K-major RHS
    if (K_pad, N_pad) != (K, N):
        w_t = jnp.pad(w_t, ((0, K_pad - K), (0, N_pad - N)))

    if bias is None:
        b_row = jnp.zeros((1, N_pad), jnp.float32)
    else:
        b = bias.astype(jnp.float32) * jnp.float32(lr_multiplier)  # bias_gain
        b_row = jnp.pad(b, (0, N_pad - N)).reshape(1, N_pad)

    return w_t, b_row, N, K


# ----------------------------------------------------------------------------
# Hot-path forward
# ----------------------------------------------------------------------------
def fc_apply(x, w_t, b_row, n_out, k_in, *, lr_multiplier=1.0,
             tm=256, tn=512, tk=1024, vmem_limit_bytes=32 * 1024 * 1024):
    """y = x @ (weight * weight_gain).T + bias * bias_gain, using prepared params."""
    M, Kx = x.shape
    assert Kx == k_in, "x feature dim must match weight in_features"
    K_pad, N_pad = w_t.shape
    compute_dtype = w_t.dtype
    out_dtype = x.dtype
    weight_gain = lr_multiplier / math.sqrt(k_in)

    # dtype-aware sublane alignment for the M dimension.
    itemsize = jnp.dtype(compute_dtype).itemsize
    m_align = 8 if itemsize >= 4 else (16 if itemsize == 2 else 32)

    # Tile selection: M clamps to the padded batch; N/K use divisors of the
    # 128-aligned extents so padding never exceeds lane alignment.
    tm_e = _round_up(min(tm, _round_up(M, m_align)), m_align)
    M_pad = _round_up(M, tm_e)
    tn_e = _largest_tile(N_pad, tn, 128)
    tk_e = _largest_tile(K_pad, tk, 128)

    # v7x megacore: make sure there are >= 2 parallel output tiles when possible.
    if (M_pad // tm_e) * (N_pad // tn_e) < 2 and N_pad >= 256:
        tn_e = _largest_tile(N_pad, N_pad // 2, 128)

    # Pad / cast the activations (small; weight is already prepared).
    x_p = x.astype(compute_dtype)
    if (M_pad, K_pad) != (M, Kx):
        x_p = jnp.pad(x_p, ((0, M_pad - M), (0, K_pad - Kx)))

    nm, nn, nk = M_pad // tm_e, N_pad // tn_e, K_pad // tk_e
    small_batch = (nm == 1)

    if small_batch:
        # Weight streams through HBM exactly once: grid = (N tiles, K tiles).
        grid = (nn, nk)
        k_axis = 1
        x_spec = pl.BlockSpec((tm_e, tk_e), lambda j, k: (0, k))
        w_spec = pl.BlockSpec((tk_e, tn_e), lambda j, k: (k, j))
        b_spec = pl.BlockSpec((1, tn_e), lambda j, k: (0, j))
        o_spec = pl.BlockSpec((tm_e, tn_e), lambda j, k: (0, j))
        dim_sem = ("parallel", "arbitrary")
    else:
        grid = (nm, nn, nk)
        k_axis = 2
        x_spec = pl.BlockSpec((tm_e, tk_e), lambda i, j, k: (i, k))
        w_spec = pl.BlockSpec((tk_e, tn_e), lambda i, j, k: (k, j))
        b_spec = pl.BlockSpec((1, tn_e), lambda i, j, k: (0, j))
        o_spec = pl.BlockSpec((tm_e, tn_e), lambda i, j, k: (i, j))
        dim_sem = ("parallel", "parallel", "arbitrary")

    if out_dtype == jnp.float32:
        kernel = functools.partial(_fc_kernel_f32out,
                                   weight_gain=weight_gain, k_axis=k_axis)
        scratch = []
    else:
        kernel = functools.partial(_fc_kernel_acc,
                                   weight_gain=weight_gain, k_axis=k_axis)
        scratch = [pltpu.VMEM((tm_e, tn_e), jnp.float32)]

    out_itemsize = jnp.dtype(out_dtype).itemsize
    cost = pl.CostEstimate(
        flops=2 * M_pad * N_pad * K_pad,
        transcendentals=0,
        bytes_accessed=(M_pad * K_pad + K_pad * N_pad) * itemsize
        + M_pad * N_pad * out_itemsize
        + N_pad * 4,
    )

    y_pad = pl.pallas_call(
        kernel,
        out_shape=jax.ShapeDtypeStruct((M_pad, N_pad), out_dtype),
        grid_spec=pltpu.PrefetchScalarGridSpec(
            num_scalar_prefetch=0,
            grid=grid,
            in_specs=[x_spec, w_spec, b_spec],
            out_specs=o_spec,
            scratch_shapes=scratch,
        ),
        compiler_params=pltpu.CompilerParams(
            dimension_semantics=dim_sem,
            vmem_limit_bytes=vmem_limit_bytes,
        ),
        cost_estimate=cost,
    )(x_p, w_t, b_row)

    if (M_pad, N_pad) != (M, n_out):
        y_pad = y_pad[:M, :n_out]
    return y_pad


def fully_connected_layer(x, weight, bias=None, *, lr_multiplier=1.0,
                          compute_dtype=jnp.bfloat16, **kwargs):
    """Convenience wrapper: prep params + apply.  For repeated calls, hoist
    prepare_fc_params() out of the step function and call fc_apply directly."""
    w_t, b_row, N, K = prepare_fc_params(
        weight, bias, lr_multiplier=lr_multiplier, compute_dtype=compute_dtype)
    return fc_apply(x, w_t, b_row, N, K, lr_multiplier=lr_multiplier, **kwargs)


if __name__ == "__main__":
    # Deterministic "init": weight ~ N(0,1)/lr_multiplier, bias = bias_init (0.0).
    in_features = 32
    out_features = 64
    batch = 16
    lr_multiplier = 1.0
    bias_init = 0.0

    key = jax.random.PRNGKey(0)
    kx, kw = jax.random.split(key)

    x = jax.random.normal(kx, (batch, in_features), dtype=jnp.float32)
    weight = (
        jax.random.normal(kw, (out_features, in_features), dtype=jnp.float32)
        / lr_multiplier
    )
    bias = jnp.full((out_features,), bias_init, dtype=jnp.float32)

    # One-time prep (hot-path-free), then the Pallas forward.
    w_t, b_row, N, K = prepare_fc_params(
        weight, bias, lr_multiplier=lr_multiplier, compute_dtype=jnp.bfloat16)
    y = fc_apply(x, w_t, b_row, N, K, lr_multiplier=lr_multiplier)
    y = jax.block_until_ready(y)

    # Reference with matching bf16 input rounding (MXU computes bf16 x bf16 -> f32).
    weight_gain = lr_multiplier / (in_features ** 0.5)
    x_bf = x.astype(jnp.bfloat16).astype(jnp.float32)
    w_bf = weight.astype(jnp.bfloat16).astype(jnp.float32)
    y_ref = x_bf @ w_bf.T * weight_gain + bias * lr_multiplier

    assert y.shape == y_ref.shape
    assert jnp.allclose(y, y_ref, atol=1e-2, rtol=1e-2), "mismatch vs reference"

    # Loose sanity check against the full-f32 torch-equivalent math.
    y_f32 = x @ (weight * weight_gain).T + bias * lr_multiplier
    assert jnp.allclose(y, y_f32, atol=5e-2, rtol=5e-2), "mismatch vs f32 reference"

    print("KERNEL_OK")
</pallas_src>

<mosaic_0001>
module attributes {stable_mosaic.version = 11 : i64} {
  func.func @_fc_kernel_f32out(%arg0: i32, %arg1: i32, %arg2: memref<16x128xbf16, #tpu.memory_space<vmem>>, %arg3: memref<128x128xbf16, #tpu.memory_space<vmem>>, %arg4: memref<1x128xf32, #tpu.memory_space<vmem>>, %arg5: memref<16x128xf32, #tpu.memory_space<vmem>>) attributes {dimension_semantics = [#tpu.dimension_semantics<parallel>, #tpu.dimension_semantics<arbitrary>], iteration_bounds = array<i64: 1, 1>, scalar_prefetch = 0 : i64, scratch_operands = 0 : i64, tpu.core_type = #tpu.core_type<tc>, window_params = [{transform_indices = @transform_0, window_bounds = array<i64: 16, 128>}, {transform_indices = @transform_1, window_bounds = array<i64: 128, 128>}, {transform_indices = @transform_2, window_bounds = array<i64: 1, 128>}, {transform_indices = @transform_3, window_bounds = array<i64: 16, 128>}]} {
    %c0_i32 = arith.constant 0 : i32
    %0 = arith.cmpi eq, %arg1, %c0_i32 : i32
    %1 = arith.extui %0 : i1 to i32
    %c0_i32_0 = arith.constant 0 : i32
    %2 = arith.cmpi ne, %1, %c0_i32_0 : i32
    scf.if %2 {
      %cst_10 = arith.constant 0.000000e+00 : f32
      %12 = vector.broadcast %cst_10 : f32 to vector<16x128xf32>
      %c0_11 = arith.constant 0 : index
      %c0_12 = arith.constant 0 : index
      %13 = vector.load %arg5[%c0_11, %c0_12] : memref<16x128xf32, #tpu.memory_space<vmem>>, vector<16x128xf32>
      tpu.vector_store %arg5[%c0_11, %c0_12], %12 {strides = array<i32>} : memref<16x128xf32, #tpu.memory_space<vmem>>, vector<16x128xf32>,
    } else {
    }
    %c0 = arith.constant 0 : index
    %c0_1 = arith.constant 0 : index
    %3 = vector.load %arg5[%c0, %c0_1] : memref<16x128xf32, #tpu.memory_space<vmem>>, vector<16x128xf32>
    %c0_2 = arith.constant 0 : index
    %c0_3 = arith.constant 0 : index
    %4 = vector.load %arg2[%c0_2, %c0_3] : memref<16x128xbf16, #tpu.memory_space<vmem>>, vector<16x128xbf16>
    %c0_4 = arith.constant 0 : index
    %c0_5 = arith.constant 0 : index
    %5 = vector.load %arg3[%c0_4, %c0_5] : memref<128x128xbf16, #tpu.memory_space<vmem>>, vector<128x128xbf16>
    %cst = arith.constant dense<0.000000e+00> : vector<16x128xf32>
    %6 = tpu.matmul %4, %5, %cst {dimension_numbers = #tpu.dot_dimension_numbers<[1], [0], [0], [1], [0, 0, 1, 1], [], []>} : vector<16x128xbf16>, vector<128x128xbf16>, vector<16x128xf32> -> vector<16x128xf32>
    %7 = arith.addf %3, %6 : vector<16x128xf32>
    %c0_6 = arith.constant 0 : index
    %c0_7 = arith.constant 0 : index
    %8 = vector.load %arg5[%c0_6, %c0_7] : memref<16x128xf32, #tpu.memory_space<vmem>>, vector<16x128xf32>
    tpu.vector_store %arg5[%c0_6, %c0_7], %7 {strides = array<i32>} : memref<16x128xf32, #tpu.memory_space<vmem>>, vector<16x128xf32>,
    %c0_i32_8 = arith.constant 0 : i32
    %9 = arith.cmpi eq, %arg1, %c0_i32_8 : i32
    %10 = arith.extui %9 : i1 to i32
    %c0_i32_9 = arith.constant 0 : i32
    %11 = arith.cmpi ne, %10, %c0_i32_9 : i32
    scf.if %11 {
      %c0_10 = arith.constant 0 : index
      %c0_11 = arith.constant 0 : index
      %12 = vector.load %arg5[%c0_10, %c0_11] : memref<16x128xf32, #tpu.memory_space<vmem>>, vector<16x128xf32>
      %cst_12 = arith.constant 0.176776692 : f32
      %13 = vector.broadcast %cst_12 : f32 to vector<16x128xf32>
      %14 = arith.mulf %12, %13 : vector<16x128xf32>
      %c0_13 = arith.constant 0 : index
      %c0_14 = arith.constant 0 : index
      %15 = vector.load %arg4[%c0_13, %c0_14] : memref<1x128xf32, #tpu.memory_space<vmem>>, vector<1x128xf32>
      %16 = vector.broadcast %15 : vector<1x128xf32> to vector<16x128xf32>
      %17 = arith.addf %14, %16 : vector<16x128xf32>
      %c0_15 = arith.constant 0 : index
      %c0_16 = arith.constant 0 : index
      %18 = vector.load %arg5[%c0_15, %c0_16] : memref<16x128xf32, #tpu.memory_space<vmem>>, vector<16x128xf32>
      tpu.vector_store %arg5[%c0_15, %c0_16], %17 {strides = array<i32>} : memref<16x128xf32, #tpu.memory_space<vmem>>, vector<16x128xf32>,
    } else {
    }
    return
  }
  func.func @transform_0(%arg0: i32, %arg1: i32) -> (i32, i32) {
    %c0_i32 = arith.constant 0 : i32
    %c0_i32_0 = arith.constant 0 : i32
    return %c0_i32, %arg1 : i32, i32
  }
  func.func @transform_1(%arg0: i32, %arg1: i32) -> (i32, i32) {
    %c0_i32 = arith.constant 0 : i32
    return %arg1, %arg0 : i32, i32
  }
  func.func @transform_2(%arg0: i32, %arg1: i32) -> (i32, i32) {
    %c0_i32 = arith.constant 0 : i32
    %c0_i32_0 = arith.constant 0 : i32
    return %c0_i32, %arg0 : i32, i32
  }
  func.func @transform_3(%arg0: i32, %arg1: i32) -> (i32, i32) {
    %c0_i32 = arith.constant 0 : i32
    %c0_i32_0 = arith.constant 0 : i32
    return %c0_i32, %arg0 : i32, i32
  }
}

</mosaic_0001>

<bundles_post_ra>
// kernel: tpu_custom_call.1
= control target key start
LH: loop header
LB: loop body
LE: loop exit
PB: predicated region body
PF: predicated region fallthrough
CT: control target
= control target key end

     0   :  { %8 = vsyncpa [#allocation3], 0  ;;  %s369_s0 = inlined_call_operand.hbm [shape: bf16[16,128], index: 0, kind: input, shape index: {}]   ;;  %s370_s1 = inlined_call_operand.hbm [shape: bf16[128,128], index: 1, kind: input, shape index: {}]   ;;  %s371_s2 = inlined_call_operand.vmem [shape: f32[1,128], index: 2, kind: input, shape index: {}]   ;;  %s372_s3 = inlined_call_operand.hbm [shape: f32[16,128], index: 3, kind: output, shape index: {}]  }
   0x1   :  { %9 = vsyncpa [#allocation6], 0 }
   0x2   :  { %10 = vsyncpa [#allocation4], 0  ;;  %s328_s12 = smov [#allocation2]  }
   0x3   :  { %s16_s13 = sshll.u32 %s328_s12, 4  ;;  %s17_s13 = int_to_ptr.vmem [resolvable:$true] %s16_s13 }
   0x4   :  { %s270_s14 = scalar_lea.vmem %s17_s13, 128  ;;  %p275_p1 = scmp.lt.s32.totalorder %s17_s13, %s17_s13 }
   0x5   :  { %p271_p0 = scmp.ne.s32.totalorder %s17_s13, %s270_s14  ;;  %p276_p2 = scmp.lt.s32.totalorder %s270_s14, %s270_s14 }
   0x7   :  { %p277_p3 = por %p276_p2, %p275_p1 }
   0x9   :  { %p278_p4 = pnand %p277_p3, %p271_p0 }
   0xb   :  { %281 = shalt.err (!%p278_p4)
}
   0xc   :  { %s329_s15 = smov 64   ;;  %s330_s16 = smov 4  }
   0xd   :  { %22 = dma.hbm_to_vmem [thread:$0]  %s369_s0, 128, %s17_s13, [#allocation3], %s329_s15, %s329_s15, %s330_s16  }
   0xe   :  { %s331_s19 = smov [#allocation5]  }
   0xf   :  { %s28_s20 = sshll.u32 %s331_s19, 4  ;;  %s29_s20 = int_to_ptr.vmem [resolvable:$true] %s28_s20 }
  0x10   :  { %s290_s21 = scalar_lea.vmem %s29_s20, 1024  ;;  %p295_p6 = scmp.lt.s32.totalorder %s29_s20, %s29_s20 }
  0x11   :  { %p291_p5 = scmp.ne.s32.totalorder %s29_s20, %s290_s21  ;;  %p296_p7 = scmp.lt.s32.totalorder %s290_s21, %s290_s21 }
  0x13   :  { %p297_p8 = por %p296_p7, %p295_p6 }
  0x15   :  { %p298_p9 = pnand %p297_p8, %p291_p5 }
  0x17   :  { %301 = shalt.err (!%p298_p9)
}
  0x18   :  { %34 = dma.hbm_to_vmem [thread:$0]  %s370_s1, 1024, %s29_s20, [#allocation6], %s329_s15, %s329_s15, %s330_s16  }
  0x19   :  { %322 = dma.done.wait [#allocation3], 128  }
  0x1a   :  { %323 = vsyncadd [#allocation3], 4294967168 }
  0x1b   :  { %324 = dma.done.wait [#allocation6], 1024  }
  0x1c   :  { %325 = vsyncadd [#allocation6], 4294966272  ;;  %v332_v0 = vmov 0.0   ;;  %vm333_vm0 = vmmov 0   ;;  %v253_v1 = vld [vmem:[#allocation5 + $0x38] sm:$0xff]   ;;  %v254_v2 = vld [vmem:[#allocation5 + $0x30] sm:$0xff]  }
  0x1d   :  { %224 = vmatprep.subr.bf16.mxu0 %v332_v0  ;;  %240 = vmatprep.mubr.msk.bf16.mxu0 %vm333_vm0, %v332_v0  ;;  %v255_v3 = vld [vmem:[#allocation5 + $0x28] sm:$0xff]   ;;  %v256_v4 = vld [vmem:[#allocation5 + $0x20] sm:$0xff]   ;;  %v257_v5 = vld [vmem:[#allocation5 + $0x18] sm:$0xff]   ;;  %s334_s24 = smov [#allocation7]  }
  0x1e   :  { %225 = vmatpush3.bf16.msra.mxu0 %v253_v1  ;;  %v258_v6 = vld [vmem:[#allocation5 + $0x10] sm:$0xff]   ;;  %v259_v7 = vld [vmem:[#allocation5 + $0x8] sm:$0xff]   ;;  %v260_v8 = vld [vmem:[#allocation5] sm:$0xff]   ;;  %s192_s25 = sshll.u32 %s334_s24, 4  ;;  %s193_s25 = int_to_ptr.vmem [resolvable:$true] %s192_s25 }
  0x1f   :  { %226 = vmatprep.subr.bf16.mxu0 %v332_v0  ;;  %v261_v9 = vld [vmem:[#allocation2] sm:$0xff]   ;;  %s302_s26 = scalar_lea.vmem %s193_s25, 256  ;;  %p307_p11 = scmp.lt.s32.totalorder %s193_s25, %s193_s25 }
  0x20   :  { %v214_v12 = vld [vmem:[%s371_s2] ss:$0 sm:$0xff]  ;;  %p303_p10 = scmp.ne.s32.totalorder %s193_s25, %s302_s26  ;;  %p308_p12 = scmp.lt.s32.totalorder %s302_s26, %s302_s26 }
  0x22   :  { %227 = vmatpush3.bf16.msra.mxu0 %v254_v2  ;;  %p309_p13 = por %p308_p12, %p307_p11 }
  0x23   :  { %228 = vmatprep.subr.bf16.mxu0 %v332_v0 }
  0x24   :  { %p310_p0 = pnand %p309_p13, %p303_p10 }
  0x26   :  { %229 = vmatpush3.bf16.msra.mxu0 %v255_v3 }
  0x27   :  { %230 = vmatprep.subr.bf16.mxu0 %v332_v0 }
  0x2a   :  { %231 = vmatpush3.bf16.msra.mxu0 %v256_v4 }
  0x2b   :  { %232 = vmatprep.subr.bf16.mxu0 %v332_v0 }
  0x2e   :  { %233 = vmatpush3.bf16.msra.mxu0 %v257_v5 }
  0x2f   :  { %234 = vmatprep.subr.bf16.mxu0 %v332_v0 }
  0x32   :  { %235 = vmatpush3.bf16.msra.mxu0 %v258_v6 }
  0x33   :  { %236 = vmatprep.subr.bf16.mxu0 %v332_v0 }
  0x36   :  { %237 = vmatpush3.bf16.msra.mxu0 %v259_v7 }
  0x37   :  { %238 = vmatprep.subr.bf16.mxu0 %v332_v0 }
  0x3a   :  { %239 = vmatpush3.bf16.msra.mxu0 %v260_v8 }
  0x3d   :  { %241 = vmatmul.mubr.bf16.vlgmr.msra.gmra.mxu0 %v261_v9 }
  0xfd   :  { %v158_v10 = vpop.f32.mrf.mxu0 }
  0xfe   :  { %v174_v13 = vmul.f32 0.17677669, %v158_v10 }
  0xff   :  { %v242_v11 = vpop.f32.mrf.mxu0 }
 0x100   :  { %v183_v15 = vadd.f32 %v214_v12, %v174_v13 }
 0x101   :  { %v161_v14 = vpop.f32.mrf.mxu0 }
 0x102   :  { %v175_v17 = vmul.f32 0.17677669, %v161_v14  ;;  %185 = vst [vmem:[#allocation7] sm:$0xff] %v183_v15 }
 0x103   :  { %v243_v16 = vpop.f32.mrf.mxu0 }
 0x104   :  { %v184_v18 = vadd.f32 %v214_v12, %v175_v17 }
 0x106   :  { %186 = vst [vmem:[#allocation7 + $0x8] sm:$0xff] %v184_v18 }
 0x107   :  { %313 = shalt.err (!%p310_p0)
}
 0x108   :  { %s335_s27 = smov 128   ;;  %s336_s2 = smov 8  }
 0x109   :  { %198 = dma.vmem_to_hbm [thread:$0]  %s193_s25, 256, %s372_s3, [#allocation4], %s335_s27, %s335_s27, %s336_s2  }
 0x10a   :  { %326 = dma.done.wait [#allocation4], 256  }
 0x10b   :  { %327 = vsyncadd [#allocation4], 4294967040 }
 0x10c   :  { %202 = vsyncpa [#allocation3], 1 }
 0x10d   :  { %203 = vsyncpa [#allocation6], 1 }
 0x10e   :  { %204 = vsyncpa [#allocation4], 1 }

</bundles_post_ra>
